<compile_context>
chip_gen: v7x
topology: tpu7x:2x2x1
jax: 0.10.0
libtpu: 0.0.40
codegen_flags: <defaults>
</compile_context>

<pallas_src>
import functools

import jax
import jax.numpy as jnp
import numpy as np
from jax.experimental import pallas as pl
from jax.experimental.pallas import tpu as pltpu

# ------------------------- config (synthetic, small) -------------------------
EMBED_DIM = 128          # embed_dim
BUCKET = 4               # cfg.bucket_size  -> window_size = 16, seq = 17
HEADS = 8                # attention_heads
NUM_LAYERS = 2           # num_layers (rel_pos_table_list length)
ALPHA = 0.5              # cfg.shrink_alpha (forward value unchanged; detach is grad-only)
LN_EPS = 1e-5            # torch.nn.LayerNorm default eps


# ----------------------------- Pallas kernel ----------------------------------
def adapter_kernel(feat_ref, bias_ref, gamma_ref, out_ref, *, eps):
    """LayerNorm a (TB, W, D) feats block and add the fused bias.

    feat_ref:  (TB, W, D) vision-tower features for TB batch elements
    bias_ref:  (W, D)     fused pos_embed[1:] + type_embedding + type_embedding_2 + ln_beta
    gamma_ref: (1, D)     LayerNorm scale
    out_ref:   (TB, W, D) adapter output rows for the non-cls tokens (fully aligned tiles)
    """
    x = feat_ref[...]                                        # (TB, W, D), W=16, D=128 aligned
    # One-pass LayerNorm statistics over the embed dim.
    mu = jnp.mean(x, axis=-1, keepdims=True)
    msq = jnp.mean(x * x, axis=-1, keepdims=True)
    var = msq - mu * mu
    xn = (x - mu) * jax.lax.rsqrt(var + eps)
    # TODO(synk): shrink_alpha (x*a + x.detach()*(1-a)) is a forward identity and is
    # omitted; a custom_vjp would be needed to reproduce its gradient scaling.
    out_ref[...] = (xn * gamma_ref[...] + bias_ref[...]).astype(out_ref.dtype)


def run_adapter(video_features, bias_feats, gamma, *, eps=LN_EPS, block_b=None):
    """Returns the LayerNormed + biased feats block (B, W, D); cls row handled in wrapper."""
    B, W, D = video_features.shape
    if block_b is None:
        # Keep >= 2 grid steps when B >= 2 so v7x megacore can shard the batch across its
        # two TensorCores; per-step overhead (~0.35us) at 2 steps is negligible.
        block_b = B if B < 2 else max(1, B // 2)
    grid_b = pl.cdiv(B, block_b)
    kern = functools.partial(adapter_kernel, eps=eps)
    return pl.pallas_call(
        kern,
        out_shape=jax.ShapeDtypeStruct((B, W, D), video_features.dtype),
        grid_spec=pltpu.PrefetchScalarGridSpec(
            num_scalar_prefetch=0,
            grid=(grid_b,),
            in_specs=[
                pl.BlockSpec((block_b, W, D), lambda b: (b, 0, 0)),  # video_features
                pl.BlockSpec((W, D), lambda b: (0, 0)),              # fused pos/type/beta bias
                pl.BlockSpec((1, D), lambda b: (0, 0)),              # LN gamma
            ],
            out_specs=pl.BlockSpec((block_b, W, D), lambda b: (b, 0, 0)),
        ),
        # Footprint is KiB-scale today; if block_b/W/D are ever scaled up, re-derive the
        # tile against v7x's 64 MiB physical VMEM and set vmem_limit_bytes explicitly
        # (v5e's default scoped VMEM is only 16 MiB).
        compiler_params=pltpu.CompilerParams(dimension_semantics=("parallel",)),
    )(video_features, bias_feats, gamma)


# --------------------------- bucket position (glue) ---------------------------
def make_bucket_position(bucket_size, num_rel_dis):
    # TODO(synk): the reference make_video_bucket_position builds a (B^3, B^3)
    # relative-coordinate matrix but assigns it into a (B^2, B^2) slice, which is
    # shape-inconsistent (would crash) for bucket_size > 1; we use the consistent
    # 2-D (h, w) bucket position that matches pos_embed's bucket_size**2 + 1 tokens.
    coords_h = np.arange(bucket_size)
    coords_w = np.arange(bucket_size)
    coords = np.stack(np.meshgrid(coords_h, coords_w, indexing="ij"))   # (2, B, B)
    coords_flatten = coords.reshape(2, -1)                              # (2, B*B)
    rel = coords_flatten[:, :, None] - coords_flatten[:, None, :]       # (2, B*B, B*B)
    rel = rel.transpose(1, 2, 0).copy()                                 # (B*B, B*B, 2)
    rel[:, :, 0] += bucket_size - 1
    rel[:, :, 1] += bucket_size - 1
    rel[:, :, 0] *= 2 * bucket_size - 1
    rpi = np.zeros((bucket_size ** 2 + 1,) * 2, dtype=np.int32)
    rpi[1:, 1:] = rel.sum(-1)
    rpi[0, :] = num_rel_dis - 3
    rpi[:, 0] = num_rel_dis - 2
    rpi[0, 0] = num_rel_dis - 1
    return rpi


def rel_pos_bias_all(rel_pos_tables, rp_bucket, bsz):
    """get_rel_pos_bias: static XLA gather (rp_bucket is a compile-time constant),
    no kernel launch, exact f32 — per perf review this beats a second pallas_call."""
    stacked = jnp.stack(rel_pos_tables, axis=0)                          # (L, NREL, H)
    idx = jnp.asarray(rp_bucket, jnp.int32)                              # (S, S)
    vals = stacked[:, idx]                                               # (L, S, S, H)
    vals = jnp.transpose(vals, (0, 3, 1, 2))                             # (L, H, S, S)
    return [jnp.broadcast_to(vals[l][None], (bsz,) + vals.shape[1:])
            for l in range(vals.shape[0])]


# ----------------------------------- main -------------------------------------
if __name__ == "__main__":
    B = 2
    W = BUCKET ** 2                     # window_size (vision-tower tokens)
    S = W + 1
    D = EMBED_DIM
    NREL = (2 * BUCKET - 1) ** 2 + 3    # num_rel_dis

    key = jax.random.PRNGKey(0)
    k_feat, k_cls, k_pos, k_chk = jax.random.split(key, 4)

    # TODO(synk): CLIPVisionModel vision tower is an external pretrained backbone;
    # we feed synthetic last-hidden-state features directly.
    video_features = jax.random.normal(k_feat, (B, W, D), jnp.float32)

    # Deterministic parameter init matching the module's __init__ shapes.
    cls_embedding = (0.02 * jax.random.truncated_normal(k_cls, -2.0, 2.0, (1, D))).astype(jnp.float32)
    pos_embed = (0.02 * jax.random.truncated_normal(k_pos, -2.0, 2.0, (S, D))).astype(jnp.float32)
    type_embedding = jnp.zeros((1, D), jnp.float32)      # nn.Parameter(torch.zeros(1,1,D))
    type_embedding_2 = jnp.zeros((1, D), jnp.float32)
    ln_gamma = jnp.ones((1, D), jnp.float32)             # LayerNorm weight
    ln_beta = jnp.zeros((1, D), jnp.float32)             # LayerNorm bias
    rel_pos_tables = [jnp.zeros((NREL, HEADS), jnp.float32)  # Embedding(..., zero_init=True)
                      for _ in range(NUM_LAYERS)]

    rp_bucket = make_bucket_position(BUCKET, NREL)       # (S, S) int32, compile-time constant

    # --- wrapper-side parameter fusion (tiny, batch-invariant) ---
    type_sum = type_embedding + type_embedding_2                          # (1, D)
    bias_feats = pos_embed[1:] + type_sum + ln_beta                       # (W, D) fused bias (+beta)
    cls_mu = cls_embedding.mean(-1, keepdims=True)
    cls_var = ((cls_embedding - cls_mu) ** 2).mean(-1, keepdims=True)
    cls_out_row = ((cls_embedding - cls_mu) * jax.lax.rsqrt(cls_var + LN_EPS)
                   * ln_gamma + ln_beta) + pos_embed[:1] + type_sum       # (1, D)

    # --- adapter hot path (Pallas): aligned (B, W, D) LN+bias block ---
    feats_out = run_adapter(video_features, bias_feats, ln_gamma)
    feats_out = jax.block_until_ready(feats_out)
    # cls row is batch-invariant: broadcast + concat in the wrapper (no unaligned kernel store).
    x = jnp.concatenate(
        [jnp.broadcast_to(cls_out_row[None], (B, 1, D)), feats_out], axis=1)   # (B, S, D)
    x = jax.block_until_ready(x)
    # TODO(synk): FairseqDropout is identity at inference; training-mode dropout not implemented.
    # TODO(synk): downstream bf16 consumers could take a bf16 out_shape here (store-only cast).

    # --- rel-pos bias: static XLA gather, no second kernel launch ---
    self_attn_bias_list = rel_pos_bias_all(rel_pos_tables, rp_bucket, B)
    self_attn_bias_list = jax.block_until_ready(self_attn_bias_list)

    padding_mask = jnp.zeros((B, S), dtype=jnp.bool_)                     # videos.new_zeros(...).bool()

    # --- pure-JAX reference check (adapter) ---
    adapter_embedding = jnp.concatenate(
        [jnp.broadcast_to(cls_embedding[None], (B, 1, D)), video_features], axis=1)
    mu = adapter_embedding.mean(-1, keepdims=True)
    var = ((adapter_embedding - mu) ** 2).mean(-1, keepdims=True)
    ref = (adapter_embedding - mu) * jax.lax.rsqrt(var + LN_EPS) * ln_gamma[0] + ln_beta[0]
    ref = ref * ALPHA + ref * (1.0 - ALPHA)                               # forward identity
    ref = ref + pos_embed[None] + type_embedding[0] + type_embedding_2[0]
    assert jnp.allclose(x, ref, atol=3e-5), float(jnp.max(jnp.abs(x - ref)))

    # --- rel-pos lookup correctness (zero-init tables + randomized exact-f32 check) ---
    assert all(b.shape == (B, HEADS, S, S) for b in self_attn_bias_list)
    assert all(bool(jnp.all(b == 0.0)) for b in self_attn_bias_list)
    chk_tables = [jax.random.normal(jax.random.fold_in(k_chk, l), (NREL, HEADS), jnp.float32)
                  for l in range(NUM_LAYERS)]
    chk_bias = jax.block_until_ready(rel_pos_bias_all(chk_tables, rp_bucket, B))
    for l in range(NUM_LAYERS):
        np_ref = np.asarray(chk_tables[l])[rp_bucket]                     # (S, S, H)
        np_ref = np.transpose(np_ref, (2, 0, 1))[None]                    # (1, H, S, S)
        assert np.allclose(np.asarray(chk_bias[l]), np.broadcast_to(np_ref, (B, HEADS, S, S)))

    assert padding_mask.shape == (B, S) and padding_mask.dtype == jnp.bool_

    print("KERNEL_OK")
</pallas_src>

<mosaic_0001>
module attributes {stable_mosaic.version = 11 : i64} {
  func.func @adapter_kernel(%arg0: i32, %arg1: memref<1x16x128xf32, #tpu.memory_space<vmem>>, %arg2: memref<16x128xf32, #tpu.memory_space<vmem>>, %arg3: memref<1x128xf32, #tpu.memory_space<vmem>>, %arg4: memref<1x16x128xf32, #tpu.memory_space<vmem>>) attributes {dimension_semantics = [#tpu.dimension_semantics<parallel>], iteration_bounds = array<i64: 2>, scalar_prefetch = 0 : i64, scratch_operands = 0 : i64, tpu.core_type = #tpu.core_type<tc>, window_params = [{transform_indices = @transform_0, window_bounds = array<i64: 1, 16, 128>}, {pipeline_mode = #tpu.pipeline_mode<synchronous>, transform_indices = @transform_1, window_bounds = array<i64: 16, 128>}, {pipeline_mode = #tpu.pipeline_mode<synchronous>, transform_indices = @transform_2, window_bounds = array<i64: 1, 128>}, {transform_indices = @transform_3, window_bounds = array<i64: 1, 16, 128>}]} {
    %c0 = arith.constant 0 : index
    %c0_0 = arith.constant 0 : index
    %c0_1 = arith.constant 0 : index
    %0 = vector.load %arg1[%c0, %c0_0, %c0_1] : memref<1x16x128xf32, #tpu.memory_space<vmem>>, vector<1x16x128xf32>
    %cst = arith.constant dense<0.000000e+00> : vector<1x16xf32>
    %1 = vector.multi_reduction <add>, %0, %cst [2] : vector<1x16x128xf32> to vector<1x16xf32>
    %2 = vector.shape_cast %1 : vector<1x16xf32> to vector<1x16x1xf32>
    %cst_2 = arith.constant 1.280000e+02 : f32
    %3 = vector.broadcast %cst_2 : f32 to vector<1x16x1xf32>
    %4 = arith.divf %2, %3 : vector<1x16x1xf32>
    %5 = arith.mulf %0, %0 : vector<1x16x128xf32>
    %cst_3 = arith.constant dense<0.000000e+00> : vector<1x16xf32>
    %6 = vector.multi_reduction <add>, %5, %cst_3 [2] : vector<1x16x128xf32> to vector<1x16xf32>
    %7 = vector.shape_cast %6 : vector<1x16xf32> to vector<1x16x1xf32>
    %cst_4 = arith.constant 1.280000e+02 : f32
    %8 = vector.broadcast %cst_4 : f32 to vector<1x16x1xf32>
    %9 = arith.divf %7, %8 : vector<1x16x1xf32>
    %10 = arith.mulf %4, %4 : vector<1x16x1xf32>
    %11 = arith.subf %9, %10 : vector<1x16x1xf32>
    %12 = vector.broadcast %4 : vector<1x16x1xf32> to vector<1x16x128xf32>
    %13 = arith.subf %0, %12 : vector<1x16x128xf32>
    %cst_5 = arith.constant 9.99999974E-6 : f32
    %14 = vector.broadcast %cst_5 : f32 to vector<1x16x1xf32>
    %15 = arith.addf %11, %14 : vector<1x16x1xf32>
    %16 = math.rsqrt %15 : vector<1x16x1xf32>
    %17 = vector.broadcast %16 : vector<1x16x1xf32> to vector<1x16x128xf32>
    %18 = arith.mulf %13, %17 : vector<1x16x128xf32>
    %c0_6 = arith.constant 0 : index
    %c0_7 = arith.constant 0 : index
    %19 = vector.load %arg3[%c0_6, %c0_7] : memref<1x128xf32, #tpu.memory_space<vmem>>, vector<1x128xf32>
    %20 = vector.shape_cast %19 : vector<1x128xf32> to vector<1x1x128xf32>
    %21 = vector.broadcast %20 : vector<1x1x128xf32> to vector<1x16x128xf32>
    %22 = arith.mulf %18, %21 : vector<1x16x128xf32>
    %c0_8 = arith.constant 0 : index
    %c0_9 = arith.constant 0 : index
    %23 = vector.load %arg2[%c0_8, %c0_9] : memref<16x128xf32, #tpu.memory_space<vmem>>, vector<16x128xf32>
    %24 = vector.shape_cast %23 : vector<16x128xf32> to vector<1x16x128xf32>
    %25 = arith.addf %22, %24 : vector<1x16x128xf32>
    %c0_10 = arith.constant 0 : index
    %c0_11 = arith.constant 0 : index
    %c0_12 = arith.constant 0 : index
    %26 = vector.load %arg4[%c0_10, %c0_11, %c0_12] : memref<1x16x128xf32, #tpu.memory_space<vmem>>, vector<1x16x128xf32>
    tpu.vector_store %arg4[%c0_10, %c0_11, %c0_12], %25 {strides = array<i32>} : memref<1x16x128xf32, #tpu.memory_space<vmem>>, vector<1x16x128xf32>,
    return
  }
  func.func @transform_0(%arg0: i32) -> (i32, i32, i32) {
    %c0_i32 = arith.constant 0 : i32
    %c0_i32_0 = arith.constant 0 : i32
    %c0_i32_1 = arith.constant 0 : i32
    return %arg0, %c0_i32, %c0_i32_0 : i32, i32, i32
  }
  func.func @transform_1(%arg0: i32) -> (i32, i32) {
    %c0_i32 = arith.constant 0 : i32
    %c0_i32_0 = arith.constant 0 : i32
    %c0_i32_1 = arith.constant 0 : i32
    return %c0_i32, %c0_i32_0 : i32, i32
  }
  func.func @transform_2(%arg0: i32) -> (i32, i32) {
    %c0_i32 = arith.constant 0 : i32
    %c0_i32_0 = arith.constant 0 : i32
    %c0_i32_1 = arith.constant 0 : i32
    return %c0_i32, %c0_i32_0 : i32, i32
  }
  func.func @transform_3(%arg0: i32) -> (i32, i32, i32) {
    %c0_i32 = arith.constant 0 : i32
    %c0_i32_0 = arith.constant 0 : i32
    %c0_i32_1 = arith.constant 0 : i32
    return %arg0, %c0_i32, %c0_i32_0 : i32, i32, i32
  }
}

</mosaic_0001>

<bundles_post_ra>
// kernel: tpu_custom_call.1
= control target key start
LH: loop header
LB: loop body
LE: loop exit
PB: predicated region body
PF: predicated region fallthrough
CT: control target
= control target key end

     0   :  { %8 = vsyncpa [#allocation3], 0  ;;  %s800_s0 = inlined_call_operand.hbm [shape: f32[2,16,128], index: 0, kind: input, shape index: {}]   ;;  %s801_s1 = inlined_call_operand.hbm [shape: f32[16,128], index: 1, kind: input, shape index: {}]   ;;  %s802_s2 = inlined_call_operand.vmem [shape: f32[1,128], index: 2, kind: input, shape index: {}]   ;;  %s803_s3 = inlined_call_operand.hbm [shape: f32[2,16,128], index: 3, kind: output, shape index: {}]  }
   0x1   :  { %10 = vsyncpa [#allocation3 + $0x1], 0 }
   0x2   :  { %11 = vsyncpa [#allocation6], 0 }
   0x3   :  { %12 = vsyncpa [#allocation4], 0 }
   0x4   :  { %14 = vsyncpa [#allocation4 + $0x1], 0  ;;  %s586_s12 = smov 0   ;;  %s588_s13 = smov 0  }
   0x5   :  { %s590_s14 = smov 0   ;;  %s592_s15 = smov 0  }
   0x6 LB: > { %s607_s16 = sadd.s32 4294967295, %s557_s15   ;;  %s345_s17 = sadd.s32 4294967294, %s557_s15   ;;  %s557_s15 = sphi %s592_s15, %s823_s15   ;;  %s553_s14 = sphi %s590_s14, %s822_s14   ;;  %s549_s13 = sphi %s588_s13, %s821_s13   ;;  %s545_s12 = sphi %s586_s12, %s820_s12  }
   0x7   : > { %p40_p0 = scmp.ne.s32.totalorder %s549_s13, %s545_s12  ;;  %p804_p1 = scmp.eq.s32.totalorder %s607_s16, 0 }
   0x8   : > { %p112_p3 = scmp.eq.s32.totalorder %s345_s17, 1  ;;  %p346_p5 = scmp.ge.s32.totalorder %s557_s15, 1 }
   0x9   : > { %p616_p4 = por %p804_p1, %p40_p0  ;;  %p119_p7 = scmp.lt.s32.totalorder %s557_s15, 3 }
   0xa   : > { %p621_p6 = por %p112_p3, %p40_p0  ;;  %s559_s21 = smov [#allocation5]  }
   0xb   : > { %s807_s18 = scalar_select %p616_p4, 1, 0 }
   0xc   : > { %s808_s19 = scalar_select %p621_p6, 1, 0 }
   0xd   : > { %p626_p8 = pnand %p346_p5, %p119_p7  ;;  %s131_s22 = sshll.u32 %s559_s21, 4  ;;  %s630_s22 = int_to_ptr.vmem [resolvable:$true] %s131_s22 }
   0xe   : > { %s642_s24 = sadd.s32 1, %s557_s15   ;;  %s27_s25 = sadd.s32 1, %s553_s14 }
   0xf   : > { %s809_s20 = scalar_select %p626_p8, 1, 0 }
  0x10   : > { %p372_p9 = pneg %p626_p8  ;;  %s24_s26 = ssub.s32 %s557_s15, %s642_s24 }
  0x11   : > { %s429_s29 = scalar_lea.hbm %s801_s1, 256 }
  0x12   : > { %p637_p11 = pnand %p372_p9, %p804_p1  ;;  %p430_p12 = scmp.ne.s32.totalorder %s801_s1, %s429_s29 }
  0x13   : > { %p436_p5 = scmp.lt.u32.totalorder %s429_s29, %s801_s1 }
  0x14   : > { %p431_p13 = pneg %p637_p11 }
  0x16   : > { %p432_p0 = pnand %p431_p13, %p430_p12 }
  0x18   : > { %p433_p3 = pneg %p432_p0 }
  0x1a   : > { %p438_p7 = pnand %p436_p5, %p433_p3 }
  0x1c   : > { %441 = shalt.err (!%p438_p7)
}
  0x1d   : > { %s442_s7 = scalar_lea.vmem %s630_s22, 256  ;;  %p450_p2 = scmp.lt.s32.totalorder %s630_s22, %s630_s22 }
  0x1e   : > { %p443_p9 = scmp.ne.s32.totalorder %s630_s22, %s442_s7  ;;  %p451_p6 = scmp.lt.s32.totalorder %s442_s7, %s442_s7 }
  0x20   : > { %p445_p10 = pnand %p443_p9, %p431_p13  ;;  %p452_p4 = por %p451_p6, %p450_p2 }
  0x22   : > { %p446_p1 = pneg %p445_p10 }
  0x24   : > { %p453_p8 = pnand %p452_p4, %p446_p1 }
  0x26   : > { %456 = shalt.err (!%p453_p8)
}
  0x27   : > { %s560_s8 = smov 128   ;;  %s561_s9 = smov 8  }
  0x28   : > { %375 = dma.hbm_to_vmem [thread:$0]  (!%p637_p11), %s801_s1, 256, %s630_s22, [#allocation6], %s560_s8, %s560_s8, %s561_s9  }
  0x29   : > { %p25_p1 = scmp.eq.s32.totalorder %s24_s26, 0  ;;  %p34_p2 = scmp.ne.s32.totalorder %s553_s14, %s549_s13 }
  0x2a   : > { %p35_p4 = scmp.eq.s32.totalorder %s557_s15, 0  ;;  %p385_p6 = scmp.lt.s32.totalorder %s557_s15, 2 }
  0x2b   : > { %s676_s17 = scalar_select %p25_p1, %s553_s14, %s27_s25  }
  0x2c   : > { %p36_p8 = por %p35_p4, %p34_p2  ;;  %p811_p10 = scmp.eq.s32.totalorder %s607_s16, 1 }
  0x2d   : > { %s148_s23 = sand.u32 1, %s553_s14   ;;  %s362_s27 = sshll.u32 %s557_s15, 8 }
  0x2e   : > { %p680_p12 = por %p811_p10, %p34_p2  ;;  %s349_s28 = sshll.u32 %s148_s23, 4 }
  0x2f   : > { %s689_s4 = scalar_lea.hbm %s800_s0, %s362_s27  ;;  %s152_s22 = scalar_lea.vmem [#allocation2], %s349_s28 }
  0x30   : > { %s159_s25 = sshll.u32 %s152_s22, 4  ;;  %p691_p11 = pnand %p385_p6, %p36_p8  ;;  %s695_s25 = int_to_ptr.vmem [resolvable:$true] %s159_s25 }
  0x31   : > { %s697_s5 = scalar_lea.sflag [#allocation3], %s148_s23  ;;  %s457_s6 = scalar_lea.hbm %s689_s4, 256 }
  0x32   : > { %p458_p13 = scmp.ne.s32.totalorder %s689_s4, %s457_s6  ;;  %p459_p0 = pneg %p691_p11 }
  0x33   : > { %s462_s11 = scalar_lea.hbm %s800_s0, 512  ;;  %p463_p7 = scmp.lt.u32.totalorder %s689_s4, %s800_s0 }
  0x34   : > { %p460_p3 = pnand %p459_p0, %p458_p13  ;;  %p464_p9 = scmp.lt.u32.totalorder %s462_s11, %s457_s6 }
  0x35   : > { %p466_p2 = scmp.lt.u32.totalorder %s457_s6, %s689_s4 }
  0x36   : > { %p461_p5 = pneg %p460_p3  ;;  %p465_p1 = por %p464_p9, %p463_p7 }
  0x38   : > { %p467_p4 = por %p466_p2, %p465_p1 }
  0x3a   : > { %p468_p6 = pnand %p467_p4, %p461_p5 }
  0x3c   : > { %471 = shalt.err (!%p468_p6)
}
  0x3d   : > { %s472_s23 = scalar_lea.vmem %s695_s25, 256  ;;  %s562_s29 = smov [#allocation2]  }
  0x3e   : > { %p473_p8 = scmp.ne.s32.totalorder %s695_s25, %s472_s23  ;;  %s477_s30 = sshll.u32 %s562_s29, 4  ;;  %s478_s30 = int_to_ptr.vmem [resolvable:$false] %s477_s30 }
  0x3f   : > { %s479_s22 = scalar_lea.vmem %s478_s30, 512  ;;  %p480_p3 = scmp.lt.s32.totalorder %s695_s25, %s478_s30 }
  0x40   : > { %p475_p10 = pnand %p473_p8, %p459_p0  ;;  %p481_p7 = scmp.lt.s32.totalorder %s479_s22, %s472_s23 }
  0x42   : > { %p476_p13 = pneg %p475_p10  ;;  %p482_p9 = por %p481_p7, %p480_p3 }
  0x44   : > { %p483_p1 = pnand %p482_p9, %p476_p13 }
  0x46   : > { %486 = shalt.err (!%p483_p1)
}
  0x47   : > { %379 = dma.hbm_to_vmem [thread:$0]  (!%p691_p11), %s689_s4, 256, %s695_s25, %s697_s5, %s560_s8, %s560_s8, %s561_s9  }
  0x48   : > { %p814_p0 = scmp.ne.s32.totalorder %s809_s20, 0 }
  0x49   : > { %s731_s6 = sand.u32 (!%p814_p0), 1, %s549_s13   ;;  %p815_p5 = scmp.ne.s32.totalorder (!%p814_p0), %s807_s18, 0 }
  0x4a   : > { %171 = sbr.rel (%p814_p0) target bundleno = 272 (0x110), region = 32  ;;  %s353_s7 = sshll.u32 (!%p814_p0), %s731_s6, 4 }
  0x4b   : > { %s174_s10 = scalar_lea.sflag (!%p814_p0), [#allocation3], %s731_s6  ;;  %s177_s26 = scalar_lea.vmem (!%p814_p0), [#allocation2], %s353_s7 }
  0x51   : > { %532 = dma.done.wait (%p815_p5), %s174_s10, 256  }
  0x52   : > { %534 = vsyncadd (%p815_p5), %s174_s10, 4294967040  ;;  %p816_p11 = scmp.eq.s32.totalorder %s607_s16, 0 }
  0x54   : > { %536 = dma.done.wait (%p816_p11), [#allocation6], 256   ;;  %p817_p2 = pmov %p816_p11 }
  0x55   : > { %v204_v0 = vld [vmem:[%s177_s26] sm:$0xff]  ;;  %v205_v1 = vld [vmem:[%s177_s26 + $0x8] sm:$0xff]  ;;  %s363_s8 = sshll.u32 %s607_s16, 8  ;;  %s203_s9 = scalar_lea.vmem [#allocation7], %s353_s7 }
  0x56   : > { %538 = vsyncadd (%p817_p2), [#allocation6], 4294967040  ;;  %206 = vadd.xlane.f32.xlu0 %v204_v0  ;;  %v213_v2 = vmul.f32 %v204_v0, %v204_v0  ;;  %v214_v3 = vmul.f32 %v205_v1, %v205_v1  ;;  %v356_v20 = vld [vmem:[%s802_s2] ss:$0 sm:$0xff]  ;;  %s262_s4 = sshll.u32 %s203_s9, 4  ;;  %v243_v28 = vld [vmem:[#allocation5 + $0x8] sm:$0xff]  ;;  %s754_s11 = scalar_lea.hbm %s803_s3, %s363_s8  ;;  %s756_s4 = int_to_ptr.vmem [resolvable:$true] %s262_s4 }
  0x57   : > { %v242_v22 = vld [vmem:[#allocation5] sm:$0xff]  ;;  %s249_s27 = scalar_lea.sflag [#allocation4], %s731_s6  ;;  %s487_s16 = scalar_lea.vmem %s756_s4, 256 }
  0x58   : > { %215 = vadd.xlane.f32.xlu1 %v213_v2  ;;  %p488_p4 = scmp.ne.s32.totalorder %s756_s4, %s487_s16  ;;  %s563_s28 = smov [#allocation7]  }
  0x59   : > { %s491_s23 = sshll.u32 %s563_s28, 4  ;;  %s492_s23 = int_to_ptr.vmem [resolvable:$false] %s491_s23 }
  0x5a   : > { %208 = vadd.xlane.f32.xlu0 %v205_v1  ;;  %p489_p6 = pnand %p488_p4, %p680_p12  ;;  %s493_s29 = scalar_lea.vmem %s492_s23, 512 }
  0x5b   : > { %p494_p10 = scmp.lt.s32.totalorder %s756_s4, %s492_s23  ;;  %p495_p13 = scmp.lt.s32.totalorder %s493_s29, %s487_s16 }
  0x5c   : > { %217 = vadd.xlane.f32.xlu1 %v214_v3  ;;  %p490_p8 = pneg %p489_p6 }
  0x5d   : > { %p496_p3 = por %p495_p13, %p494_p10 }
  0x5f   : > { %p497_p7 = pnand %p496_p3, %p490_p8 }
  0xe3   : > { %v207_v4 = vpop.xlane.xlu0 %206 }
  0xe4   : > { %v211_v5 = vmul.f32 0.0078125, %v207_v4 }
  0xe5   : > { %v216_v6 = vpop.xlane.xlu1 %215 }
  0xe6   : > { %v221_v7 = vmul.f32 %v211_v5, %v211_v5  ;;  %v219_v8 = vmul.f32 0.0078125, %v216_v6  ;;  %v225_v18 = vsub.f32 %v204_v0, %v211_v5 }
  0xe7   : > { %v209_v9 = vpop.xlane.xlu0 %208 }
  0xe8   : > { %v223_v10 = vsub.f32 %v219_v8, %v221_v7  ;;  %v212_v11 = vmul.f32 0.0078125, %v209_v9 }
  0xe9   : > { %v218_v12 = vpop.xlane.xlu1 %217 }
  0xea   : > { %v227_v13 = vadd.f32 1e-05, %v223_v10  ;;  %v222_v14 = vmul.f32 %v212_v11, %v212_v11  ;;  %v220_v15 = vmul.f32 0.0078125, %v218_v12  ;;  %v226_v24 = vsub.f32 %v205_v1, %v212_v11 }
  0xec   : > { %425 = vrsqrt.f32 %v227_v13  ;;  %v224_v16 = vsub.f32 %v220_v15, %v222_v14 }
  0xee   : > { %v228_v17 = vadd.f32 1e-05, %v224_v16 }
  0xf0   : > { %427 = vrsqrt.f32 %v228_v17 }
  0xf6   : > { %v426_v19 = vpop.eup %425 }
  0xf7   : > { %v231_v21 = vmul.f32 %v426_v19, %v225_v18 }
  0xf9   : > { %v240_v23 = vmul.f32 %v356_v20, %v231_v21 }
  0xfa   : > { %v428_v25 = vpop.eup %427 }
  0xfb   : > { %v244_v26 = vadd.f32 %v242_v22, %v240_v23  ;;  %v232_v27 = vmul.f32 %v428_v25, %v226_v24 }
  0xfd   : > { %v241_v29 = vmul.f32 %v356_v20, %v232_v27  ;;  %246 = vst [vmem:[%s203_s9] sm:$0xff] %v244_v26 }
  0xff   : > { %v245_v30 = vadd.f32 %v243_v28, %v241_v29 }
 0x101   : > { %247 = vst [vmem:[%s203_s9 + $0x8] sm:$0xff] %v245_v30 }
 0x102   : > { %500 = shalt.err (!%p497_p7)
}
 0x103   : > { %s501_s30 = scalar_lea.hbm %s754_s11, 256  ;;  %s505_s10 = scalar_lea.hbm %s803_s3, 512 }
 0x104   : > { %p502_p9 = scmp.ne.s32.totalorder %s754_s11, %s501_s30  ;;  %p506_p5 = scmp.lt.u32.totalorder %s754_s11, %s803_s3 }
 0x105   : > { %p507_p11 = scmp.lt.u32.totalorder %s505_s10, %s501_s30  ;;  %p509_p4 = scmp.lt.u32.totalorder %s501_s30, %s754_s11 }
 0x106   : > { %p503_p1 = pnand %p502_p9, %p680_p12 }
 0x107   : > { %p508_p2 = por %p507_p11, %p506_p5 }
 0x108   : > { %p504_p0 = pneg %p503_p1 }
 0x109   : > { %p510_p6 = por %p509_p4, %p508_p2 }
 0x10b   : > { %p511_p8 = pnand %p510_p6, %p504_p0 }
 0x10d   : > { %514 = shalt.err (!%p511_p8)
}
 0x10e   : > { %s564_s20 = smov 128   ;;  %s565_s8 = smov 8  }
 0x10f   : > { %370 = dma.vmem_to_hbm [thread:$0]  (%p680_p12), %s756_s4, 256, %s754_s11, %s249_s27, %s564_s20, %s564_s20, %s565_s8  }
 0x110 PF: > { %s277_s9 = sand.u32 1, %s545_s12   ;;  %p818_p10 = scmp.ne.s32.totalorder %s808_s19, 0 }
 0x111   : > { %p819_p13 = scmp.ge.s32.totalorder %s557_s15, 2  ;;  %s278_s25 = scalar_lea.sflag [#allocation4], %s277_s9 }
 0x113   : > { %p381_p3 = pnand %p819_p13, %p818_p10 }
 0x115   : > { %540 = dma.done.wait (!%p381_p3), %s278_s25, 256  }
 0x116   : > { %542 = vsyncadd (!%p381_p3), %s278_s25, 4294967040  ;;  %p17_p7 = scmp.ge.s32.totalorder %s642_s24, 4   ;;  %s820_s12 = smov %s549_s13 }
 0x117   : > { %s821_s13 = smov %s553_s14  ;;  %s822_s14 = smov %s676_s17 }
 0x118   : > { %s823_s15 = smov %s642_s24  ;;  %19 = sbr.rel (!%p17_p7) target bundleno = 6 (0x6), region = 81 }
 0x11f   :  { %283 = vsyncpa [#allocation3], 1 }
 0x120   :  { %285 = vsyncpa [#allocation3 + $0x1], 1 }
 0x121   :  { %286 = vsyncpa [#allocation6], 1 }
 0x122   :  { %287 = vsyncpa [#allocation4], 1 }
 0x123   :  { %289 = vsyncpa [#allocation4 + $0x1], 1 }

</bundles_post_ra>
